<compile_context>
chip_gen: v6e
topology: v6e:2x2x1
jax: 0.10.0
libtpu: 0.0.40
codegen_flags: <defaults>
</compile_context>

<pallas_src>
import functools

import numpy as np

import jax
import jax.numpy as jnp
from jax.experimental import pallas as pl
from jax.experimental.pallas import tpu as pltpu


def _lrelu(x, slope=0.2):
    return jnp.where(x >= 0, x, slope * x)


def us_kernel(x_ref, w1_ref, b1_ref, wpa_ref, bpa_ref, wph_ref, b2_ref, o_ref,
              *, tile_rows, lr_h):
    # x_ref : (1, H_pad + 2, W, C) bf16 low-res image, zero halo rows.
    # o_ref : (1, TH, W, s*s*C)    pixel-shuffle-ready output tile (lane dense).
    TH = tile_rows
    W = x_ref.shape[2]
    C = x_ref.shape[3]
    P = o_ref.shape[3]                                   # s*s*C phase columns

    r = pl.program_id(1)
    row0 = r * TH                                        # padded-image row of the halo top

    # Low-res rows needed by this tile (+1 halo row each side).
    xt = x_ref[0, pl.ds(row0, TH + 2), :, :]             # (TH+2, W, C) bf16
    xt = xt.reshape((TH + 2) * W, C)

    # conv1 (1x1) + LeakyReLU(0.2): bf16 operands, f32 accumulate.
    y = jnp.dot(xt, w1_ref[...], preferred_element_type=jnp.float32) + b1_ref[...]
    y = _lrelu(y)

    # pa_conv (1x1) + sigmoid, pixel attention: z = y * sigmoid(a) + y.
    a = jnp.dot(y.astype(jnp.bfloat16), wpa_ref[...],
                preferred_element_type=jnp.float32) + bpa_ref[...]
    z = y * jax.nn.sigmoid(a) + y                        # ((TH+2)*W, C) f32

    # Zero halo rows outside the real image: conv2's zero padding applies to z
    # itself, not to conv1(0) (which would be nonzero through the biases).
    z = z.reshape(TH + 2, W, C)
    lr_row = row0 - 1 + jax.lax.broadcasted_iota(jnp.int32, (TH + 2, 1, 1), 0)
    z = jnp.where((lr_row >= 0) & (lr_row < lr_h), z, 0.0).astype(jnp.bfloat16)

    # Horizontal zero pad + im2col at LOW resolution: (TH*W, 9C) bf16.
    zp = jnp.pad(z, ((0, 0), (1, 1), (0, 0)))            # (TH+2, W+2, C)
    cols = [zp[ky:ky + TH, kx:kx + W, :].reshape(TH * W, C)
            for ky in range(3) for kx in range(3)]
    patches = jnp.concatenate(cols, axis=1)              # (TH*W, 9C)

    # Fused nearest-upsample + conv2 via the phase weight (N = s*s*C lanes).
    acc = jnp.dot(patches, wph_ref[...], preferred_element_type=jnp.float32)
    out = _lrelu(acc + b2_ref[...])                      # (TH*W, P) f32
    o_ref[0] = out.reshape(TH, W, P).astype(o_ref.dtype)  # free reshape, dense store


def _phase_weight(w2, scale):
    """Fold a nearest-neighbor x`scale` upsample into the 3x3 conv.

    w2: (3, 3, C_in, C_out) HWIO.  Returns (9*C_in, scale^2*C_out) with rows
    ordered (ky, kx, ci) over the LOW-RES 3x3 window and columns ordered
    (py, px, co) over the scale^2 output phases."""
    s = scale
    Ci, Co = w2.shape[2], w2.shape[3]
    sel = np.zeros((3, 3, 3, 3, s, s), np.float32)       # [dy, dx, ky, kx, py, px]
    for py in range(s):
        for px in range(s):
            for dy in range(3):
                for dx in range(3):
                    ky = (py + dy - 1) // s + 1          # low-res tap this hi-res tap aliases to
                    kx = (px + dx - 1) // s + 1
                    sel[dy, dx, ky, kx, py, px] = 1.0
    wph = jnp.einsum('yxklpq,yxio->klipqo', jnp.asarray(sel), w2)
    return wph.reshape(9 * Ci, s * s * Co)


def _vmem_budget_bytes():
    """Per-generation VMEM budget: ~48 MiB on v7x (64 MiB/TC), ~96 MiB on v5e/v6e."""
    cap = 128 << 20
    try:
        info = pltpu.get_tpu_info()
        cap = getattr(info, "vmem_capacity_bytes", cap) or cap
    except Exception:
        pass
    return int(min(cap * 3 // 4, 96 << 20))


def _pick_tile_rows(H, W, C, scale, budget_bytes):
    """Largest tile-row count whose per-step VMEM footprint fits the budget."""
    P = scale * scale * C
    best = 1
    for th in range(1, H + 1):
        hp = pl.cdiv(H, th) * th
        est = (
            2 * (hp + 2) * W * C * 2            # resident low-res image (bf16, dbl-buffered)
            + 2 * th * W * P * 4                # double-buffered output tile (f32)
            + 4 * (th + 2) * (W + 2) * C * 4    # xt / y / z / zp temporaries
            + 2 * th * W * 9 * C * 2            # im2col patches (+ temp copy), bf16
            + 2 * th * W * P * 4                # matmul acc / activated result, f32
        )
        if est <= budget_bytes:
            best = th
    return best


def us_forward(x_nchw, params, *, scale, tile_rows=None, out_dtype=jnp.float32):
    """US block forward. x_nchw: (N, C, H, W) float32 -> (N, C, H*s, W*s)."""
    w1, b1, wpa, bpa, w2, b2 = params
    N, C, H, W = x_nchw.shape
    s = scale
    Hs, Ws = H * s, W * s
    P = s * s * C

    budget = _vmem_budget_bytes()
    TH = tile_rows if tile_rows is not None else _pick_tile_rows(H, W, C, s, budget)
    TH = max(1, min(TH, H))
    num_tiles = pl.cdiv(H, TH)
    H_pad = num_tiles * TH

    # API boundary: NCHW -> NHWC (low-res, bf16); one zero halo row on top and
    # (H_pad - H) + 1 zero rows on the bottom so every row tile can read
    # TH + 2 low-res rows in-bounds.  No upsample here: it is folded into the
    # phase weight inside the kernel.
    x = jnp.transpose(x_nchw, (0, 2, 3, 1)).astype(jnp.bfloat16)
    x = jnp.pad(x, ((0, 0), (1, H_pad - H + 1), (0, 0), (0, 0)))

    w1b = w1.astype(jnp.bfloat16)
    wpab = wpa.astype(jnp.bfloat16)
    wph = _phase_weight(w2, s).astype(jnp.bfloat16)      # (9C, s^2*C)
    b2t = jnp.tile(b2, (1, s * s))                       # (1, s^2*C), per-phase bias

    kernel = functools.partial(us_kernel, tile_rows=TH, lr_h=H)

    out = pl.pallas_call(
        kernel,
        out_shape=jax.ShapeDtypeStruct((N, H_pad, W, P), out_dtype),
        grid_spec=pltpu.PrefetchScalarGridSpec(
            num_scalar_prefetch=0,
            grid=(N, num_tiles),
            in_specs=[
                # full low-res image per batch element, resident across r
                pl.BlockSpec((1, H_pad + 2, W, C), lambda n, r: (n, 0, 0, 0)),
                pl.BlockSpec((C, C), lambda n, r: (0, 0)),
                pl.BlockSpec((1, C), lambda n, r: (0, 0)),
                pl.BlockSpec((C, C), lambda n, r: (0, 0)),
                pl.BlockSpec((1, C), lambda n, r: (0, 0)),
                pl.BlockSpec((9 * C, P), lambda n, r: (0, 0)),
                pl.BlockSpec((1, P), lambda n, r: (0, 0)),
            ],
            out_specs=pl.BlockSpec((1, TH, W, P), lambda n, r: (n, r, 0, 0)),
        ),
        compiler_params=pltpu.CompilerParams(
            dimension_semantics=("parallel", "parallel"),
            vmem_limit_bytes=budget,
        ),
    )(x, w1b, b1, wpab, bpa, wph, b2t)

    # Drop padded remainder rows, then depth-to-space (phases -> pixels) fused
    # with the NHWC -> NCHW transpose in a single XLA copy.
    out = out[:, :H]                                     # (N, H, W, s*s*C)
    out = out.reshape(N, H, W, s, s, C)                  # [n, y, x, py, px, c]
    out = jnp.transpose(out, (0, 5, 1, 3, 2, 4))         # [n, c, y, py, x, px]
    return out.reshape(N, C, Hs, Ws)


def us_reference(x_nchw, params, scale):
    """Pure-JAX f32 reference matching the PyTorch forward."""
    w1, b1, wpa, bpa, w2, b2 = params
    x = jnp.transpose(x_nchw, (0, 2, 3, 1))
    x = jnp.repeat(jnp.repeat(x, scale, axis=1), scale, axis=2)
    y = jnp.einsum('nhwc,cd->nhwd', x, w1) + b1[0]
    y = _lrelu(y)
    z = jax.nn.sigmoid(jnp.einsum('nhwc,cd->nhwd', y, wpa) + bpa[0])
    z = y * z + y
    out = jax.lax.conv_general_dilated(
        z, w2, (1, 1), 'SAME',
        dimension_numbers=('NHWC', 'HWIO', 'NHWC')) + b2[0]
    out = _lrelu(out)
    return jnp.transpose(out, (0, 3, 1, 2))


def make_params(key, num_feat):
    """Deterministic synthetic parameters.
    1x1 conv weights stored as (C_in, C_out); 3x3 conv weight stored HWIO
    (3, 3, C_in, C_out); biases stored as (1, C)."""
    ks = jax.random.split(key, 6)
    C = num_feat
    s = 0.1
    w1 = jax.random.normal(ks[0], (C, C), jnp.float32) * s
    b1 = jax.random.normal(ks[1], (1, C), jnp.float32) * s
    wpa = jax.random.normal(ks[2], (C, C), jnp.float32) * s
    bpa = jax.random.normal(ks[3], (1, C), jnp.float32) * s
    w2 = jax.random.normal(ks[4], (3, 3, C, C), jnp.float32) * s
    b2 = jax.random.normal(ks[5], (1, C), jnp.float32) * s
    return (w1, b1, wpa, bpa, w2, b2)


if __name__ == "__main__":
    key = jax.random.PRNGKey(0)
    k_x, k_p = jax.random.split(key)

    num_feat = 32
    scale = 2
    N, H, W = 2, 16, 16

    x = jax.random.normal(k_x, (N, num_feat, H, W), jnp.float32)
    params = make_params(k_p, num_feat)

    ref = us_reference(x, params, scale)

    # Remainder-tile path (TH does not divide H): exercises the cdiv grid, the
    # zero-padded last tile, and the 3x3 halo handling across tile seams.
    fwd_tiled = jax.jit(functools.partial(us_forward, scale=scale, tile_rows=5))
    out = jax.block_until_ready(fwd_tiled(x, params))
    assert out.shape == (N, num_feat, H * scale, W * scale)
    err = jnp.max(jnp.abs(out - ref))
    assert jnp.allclose(out, ref, rtol=5e-2, atol=5e-2), f"max abs err = {err}"

    # Auto-picked tile size (single-tile path at these small shapes).
    fwd_auto = jax.jit(functools.partial(us_forward, scale=scale))
    out2 = jax.block_until_ready(fwd_auto(x, params))
    err2 = jnp.max(jnp.abs(out2 - ref))
    assert jnp.allclose(out2, ref, rtol=5e-2, atol=5e-2), f"max abs err = {err2}"

    print("KERNEL_OK")
</pallas_src>

<mosaic_0001>
module attributes {stable_mosaic.version = 11 : i64} {
  func.func @us_kernel(%arg0: i32, %arg1: i32, %arg2: memref<1x22x16x32xbf16, #tpu.memory_space<vmem>>, %arg3: memref<32x32xbf16, #tpu.memory_space<vmem>>, %arg4: memref<1x32xf32, #tpu.memory_space<vmem>>, %arg5: memref<32x32xbf16, #tpu.memory_space<vmem>>, %arg6: memref<1x32xf32, #tpu.memory_space<vmem>>, %arg7: memref<288x128xbf16, #tpu.memory_space<vmem>>, %arg8: memref<1x128xf32, #tpu.memory_space<vmem>>, %arg9: memref<1x5x16x128xf32, #tpu.memory_space<vmem>>) attributes {dimension_semantics = [#tpu.dimension_semantics<parallel>, #tpu.dimension_semantics<parallel>], iteration_bounds = array<i64: 2, 4>, scalar_prefetch = 0 : i64, scratch_operands = 0 : i64, tpu.core_type = #tpu.core_type<tc>, window_params = [{transform_indices = @transform_0, window_bounds = array<i64: 1, 22, 16, 32>}, {pipeline_mode = #tpu.pipeline_mode<synchronous>, transform_indices = @transform_1, window_bounds = array<i64: 32, 32>}, {pipeline_mode = #tpu.pipeline_mode<synchronous>, transform_indices = @transform_2, window_bounds = array<i64: 1, 32>}, {pipeline_mode = #tpu.pipeline_mode<synchronous>, transform_indices = @transform_3, window_bounds = array<i64: 32, 32>}, {pipeline_mode = #tpu.pipeline_mode<synchronous>, transform_indices = @transform_4, window_bounds = array<i64: 1, 32>}, {pipeline_mode = #tpu.pipeline_mode<synchronous>, transform_indices = @transform_5, window_bounds = array<i64: 288, 128>}, {pipeline_mode = #tpu.pipeline_mode<synchronous>, transform_indices = @transform_6, window_bounds = array<i64: 1, 128>}, {transform_indices = @transform_7, window_bounds = array<i64: 1, 5, 16, 128>}]} {
    %c5_i32 = arith.constant 5 : i32
    %0 = arith.muli %arg1, %c5_i32 : i32
    %c0 = arith.constant 0 : index
    %1 = arith.index_cast %0 : i32 to index
    %c0_0 = arith.constant 0 : index
    %c0_1 = arith.constant 0 : index
    %2 = vector.load %arg2[%c0, %1, %c0_0, %c0_1] : memref<1x22x16x32xbf16, #tpu.memory_space<vmem>>, vector<1x7x16x32xbf16>
    %3 = vector.shape_cast %2 : vector<1x7x16x32xbf16> to vector<7x16x32xbf16>
    %4 = vector.shape_cast %3 : vector<7x16x32xbf16> to vector<112x32xbf16>
    %c0_2 = arith.constant 0 : index
    %c0_3 = arith.constant 0 : index
    %5 = vector.load %arg3[%c0_2, %c0_3] : memref<32x32xbf16, #tpu.memory_space<vmem>>, vector<32x32xbf16>
    %cst = arith.constant dense<0.000000e+00> : vector<112x32xf32>
    %6 = tpu.matmul %4, %5, %cst {dimension_numbers = #tpu.dot_dimension_numbers<[1], [0], [0], [1], [0, 0, 1, 1], [], []>} : vector<112x32xbf16>, vector<32x32xbf16>, vector<112x32xf32> -> vector<112x32xf32>
    %c0_4 = arith.constant 0 : index
    %c0_5 = arith.constant 0 : index
    %7 = vector.load %arg4[%c0_4, %c0_5] : memref<1x32xf32, #tpu.memory_space<vmem>>, vector<1x32xf32>
    %8 = vector.broadcast %7 : vector<1x32xf32> to vector<112x32xf32>
    %9 = arith.addf %6, %8 : vector<112x32xf32>
    %cst_6 = arith.constant 0.000000e+00 : f32
    %10 = vector.broadcast %cst_6 : f32 to vector<112x32xf32>
    %11 = arith.cmpf oge, %9, %10 : vector<112x32xf32>
    %cst_7 = arith.constant 2.000000e-01 : f32
    %12 = vector.broadcast %cst_7 : f32 to vector<112x32xf32>
    %13 = arith.mulf %12, %9 : vector<112x32xf32>
    %14 = arith.select %11, %9, %13 : vector<112x32xi1>, vector<112x32xf32>
    %15 = arith.truncf %14 : vector<112x32xf32> to vector<112x32xbf16>
    %c0_8 = arith.constant 0 : index
    %c0_9 = arith.constant 0 : index
    %16 = vector.load %arg5[%c0_8, %c0_9] : memref<32x32xbf16, #tpu.memory_space<vmem>>, vector<32x32xbf16>
    %cst_10 = arith.constant dense<0.000000e+00> : vector<112x32xf32>
    %17 = tpu.matmul %15, %16, %cst_10 {dimension_numbers = #tpu.dot_dimension_numbers<[1], [0], [0], [1], [0, 0, 1, 1], [], []>} : vector<112x32xbf16>, vector<32x32xbf16>, vector<112x32xf32> -> vector<112x32xf32>
    %c0_11 = arith.constant 0 : index
    %c0_12 = arith.constant 0 : index
    %18 = vector.load %arg6[%c0_11, %c0_12] : memref<1x32xf32, #tpu.memory_space<vmem>>, vector<1x32xf32>
    %19 = vector.broadcast %18 : vector<1x32xf32> to vector<112x32xf32>
    %20 = arith.addf %17, %19 : vector<112x32xf32>
    %21 = arith.negf %20 : vector<112x32xf32>
    %22 = math.exp %21 : vector<112x32xf32>
    %cst_13 = arith.constant 1.000000e+00 : f32
    %23 = vector.broadcast %cst_13 : f32 to vector<112x32xf32>
    %24 = arith.addf %23, %22 : vector<112x32xf32>
    %25 = arith.divf %23, %24 : vector<112x32xf32>
    %26 = arith.mulf %14, %25 : vector<112x32xf32>
    %27 = arith.addf %26, %14 : vector<112x32xf32>
    %28 = vector.shape_cast %27 : vector<112x32xf32> to vector<7x16x32xf32>
    %c1_i32 = arith.constant 1 : i32
    %29 = arith.subi %0, %c1_i32 : i32
    %30 = tpu.iota {dimensions = array<i32: 0>} : vector<7x1x1xi32>
    %31 = vector.broadcast %29 : i32 to vector<7x1x1xi32>
    %32 = arith.addi %31, %30 : vector<7x1x1xi32>
    %c0_i32 = arith.constant 0 : i32
    %33 = vector.broadcast %c0_i32 : i32 to vector<7x1x1xi32>
    %34 = arith.cmpi sge, %32, %33 : vector<7x1x1xi32>
    %c16_i32 = arith.constant 16 : i32
    %35 = vector.broadcast %c16_i32 : i32 to vector<7x1x1xi32>
    %36 = arith.cmpi slt, %32, %35 : vector<7x1x1xi32>
    %37 = arith.andi %34, %36 : vector<7x1x1xi1>
    %cst_14 = arith.constant 0.000000e+00 : f32
    %38 = vector.shape_cast %37 : vector<7x1x1xi1> to vector<7x1x1xi1>
    %39 = vector.broadcast %38 : vector<7x1x1xi1> to vector<7x16x32xi1>
    %40 = vector.broadcast %cst_14 : f32 to vector<7x16x32xf32>
    %41 = arith.select %39, %28, %40 : vector<7x16x32xi1>, vector<7x16x32xf32>
    %42 = arith.truncf %41 : vector<7x16x32xf32> to vector<7x16x32xbf16>
    %c0_i32_15 = arith.constant 0 : i32
    %43 = arith.sitofp %c0_i32_15 : i32 to bf16
    %44 = vector.broadcast %43 : bf16 to vector<7x1x32xbf16>
    %45 = tpu.concatenate %44, %42 in 1 : vector<7x1x32xbf16>, vector<7x16x32xbf16> -> vector<7x17x32xbf16>
    %46 = vector.broadcast %43 : bf16 to vector<7x1x32xbf16>
    %47 = tpu.concatenate %45, %46 in 1 : vector<7x17x32xbf16>, vector<7x1x32xbf16> -> vector<7x18x32xbf16>
    %48 = vector.extract_strided_slice %47 {offsets = [0, 0, 0], sizes = [5, 16, 32], strides = [1, 1, 1]} : vector<7x18x32xbf16> to vector<5x16x32xbf16>
    %49 = vector.shape_cast %48 : vector<5x16x32xbf16> to vector<80x32xbf16>
    %50 = vector.extract_strided_slice %47 {offsets = [0, 1, 0], sizes = [5, 16, 32], strides = [1, 1, 1]} : vector<7x18x32xbf16> to vector<5x16x32xbf16>
    %51 = vector.shape_cast %50 : vector<5x16x32xbf16> to vector<80x32xbf16>
    %52 = vector.extract_strided_slice %47 {offsets = [0, 2, 0], sizes = [5, 16, 32], strides = [1, 1, 1]} : vector<7x18x32xbf16> to vector<5x16x32xbf16>
    %53 = vector.shape_cast %52 : vector<5x16x32xbf16> to vector<80x32xbf16>
    %54 = vector.extract_strided_slice %47 {offsets = [1, 0, 0], sizes = [5, 16, 32], strides = [1, 1, 1]} : vector<7x18x32xbf16> to vector<5x16x32xbf16>
    %55 = vector.shape_cast %54 : vector<5x16x32xbf16> to vector<80x32xbf16>
    %56 = vector.extract_strided_slice %47 {offsets = [1, 1, 0], sizes = [5, 16, 32], strides = [1, 1, 1]} : vector<7x18x32xbf16> to vector<5x16x32xbf16>
    %57 = vector.shape_cast %56 : vector<5x16x32xbf16> to vector<80x32xbf16>
    %58 = vector.extract_strided_slice %47 {offsets = [1, 2, 0], sizes = [5, 16, 32], strides = [1, 1, 1]} : vector<7x18x32xbf16> to vector<5x16x32xbf16>
    %59 = vector.shape_cast %58 : vector<5x16x32xbf16> to vector<80x32xbf16>
    %60 = vector.extract_strided_slice %47 {offsets = [2, 0, 0], sizes = [5, 16, 32], strides = [1, 1, 1]} : vector<7x18x32xbf16> to vector<5x16x32xbf16>
    %61 = vector.shape_cast %60 : vector<5x16x32xbf16> to vector<80x32xbf16>
    %62 = vector.extract_strided_slice %47 {offsets = [2, 1, 0], sizes = [5, 16, 32], strides = [1, 1, 1]} : vector<7x18x32xbf16> to vector<5x16x32xbf16>
    %63 = vector.shape_cast %62 : vector<5x16x32xbf16> to vector<80x32xbf16>
    %64 = vector.extract_strided_slice %47 {offsets = [2, 2, 0], sizes = [5, 16, 32], strides = [1, 1, 1]} : vector<7x18x32xbf16> to vector<5x16x32xbf16>
    %65 = vector.shape_cast %64 : vector<5x16x32xbf16> to vector<80x32xbf16>
    %66 = tpu.concatenate %49, %51, %53, %55, %57, %59, %61, %63, %65 in 1 : vector<80x32xbf16>, vector<80x32xbf16>, vector<80x32xbf16>, vector<80x32xbf16>, vector<80x32xbf16>, vector<80x32xbf16>, vector<80x32xbf16>, vector<80x32xbf16>, vector<80x32xbf16> -> vector<80x288xbf16>
    %c0_16 = arith.constant 0 : index
    %c0_17 = arith.constant 0 : index
    %67 = vector.load %arg7[%c0_16, %c0_17] : memref<288x128xbf16, #tpu.memory_space<vmem>>, vector<288x128xbf16>
    %cst_18 = arith.constant dense<0.000000e+00> : vector<80x128xf32>
    %68 = tpu.matmul %66, %67, %cst_18 {dimension_numbers = #tpu.dot_dimension_numbers<[1], [0], [0], [1], [0, 0, 1, 1], [], []>} : vector<80x288xbf16>, vector<288x128xbf16>, vector<80x128xf32> -> vector<80x128xf32>
    %c0_19 = arith.constant 0 : index
    %c0_20 = arith.constant 0 : index
    %69 = vector.load %arg8[%c0_19, %c0_20] : memref<1x128xf32, #tpu.memory_space<vmem>>, vector<1x128xf32>
    %70 = vector.broadcast %69 : vector<1x128xf32> to vector<80x128xf32>
    %71 = arith.addf %68, %70 : vector<80x128xf32>
    %cst_21 = arith.constant 0.000000e+00 : f32
    %72 = vector.broadcast %cst_21 : f32 to vector<80x128xf32>
    %73 = arith.cmpf oge, %71, %72 : vector<80x128xf32>
    %cst_22 = arith.constant 2.000000e-01 : f32
    %74 = vector.broadcast %cst_22 : f32 to vector<80x128xf32>
    %75 = arith.mulf %74, %71 : vector<80x128xf32>
    %76 = arith.select %73, %71, %75 : vector<80x128xi1>, vector<80x128xf32>
    %77 = vector.shape_cast %76 : vector<80x128xf32> to vector<5x16x128xf32>
    %c0_23 = arith.constant 0 : index
    %c0_24 = arith.constant 0 : index
    %c0_25 = arith.constant 0 : index
    %c0_26 = arith.constant 0 : index
    %78 = vector.load %arg9[%c0_23, %c0_24, %c0_25, %c0_26] : memref<1x5x16x128xf32, #tpu.memory_space<vmem>>, vector<1x5x16x128xf32>
    %79 = vector.shape_cast %78 : vector<1x5x16x128xf32> to vector<5x16x128xf32>
    %80 = vector.shape_cast %77 : vector<5x16x128xf32> to vector<1x5x16x128xf32>
    tpu.vector_store %arg9[%c0_23, %c0_24, %c0_25, %c0_26], %80 {strides = array<i32>} : memref<1x5x16x128xf32, #tpu.memory_space<vmem>>, vector<1x5x16x128xf32>,
    return
  }
  func.func @transform_0(%arg0: i32, %arg1: i32) -> (i32, i32, i32, i32) {
    %c0_i32 = arith.constant 0 : i32
    %c0_i32_0 = arith.constant 0 : i32
    %c0_i32_1 = arith.constant 0 : i32
    %c0_i32_2 = arith.constant 0 : i32
    return %arg0, %c0_i32, %c0_i32_0, %c0_i32_1 : i32, i32, i32, i32
  }
  func.func @transform_1(%arg0: i32, %arg1: i32) -> (i32, i32) {
    %c0_i32 = arith.constant 0 : i32
    %c0_i32_0 = arith.constant 0 : i32
    %c0_i32_1 = arith.constant 0 : i32
    return %c0_i32, %c0_i32_0 : i32, i32
  }
  func.func @transform_2(%arg0: i32, %arg1: i32) -> (i32, i32) {
    %c0_i32 = arith.constant 0 : i32
    %c0_i32_0 = arith.constant 0 : i32
    %c0_i32_1 = arith.constant 0 : i32
    return %c0_i32, %c0_i32_0 : i32, i32
  }
  func.func @transform_3(%arg0: i32, %arg1: i32) -> (i32, i32) {
    %c0_i32 = arith.constant 0 : i32
    %c0_i32_0 = arith.constant 0 : i32
    %c0_i32_1 = arith.constant 0 : i32
    return %c0_i32, %c0_i32_0 : i32, i32
  }
  func.func @transform_4(%arg0: i32, %arg1: i32) -> (i32, i32) {
    %c0_i32 = arith.constant 0 : i32
    %c0_i32_0 = arith.constant 0 : i32
    %c0_i32_1 = arith.constant 0 : i32
    return %c0_i32, %c0_i32_0 : i32, i32
  }
  func.func @transform_5(%arg0: i32, %arg1: i32) -> (i32, i32) {
    %c0_i32 = arith.constant 0 : i32
    %c0_i32_0 = arith.constant 0 : i32
    %c0_i32_1 = arith.constant 0 : i32
    return %c0_i32, %c0_i32_0 : i32, i32
  }
  func.func @transform_6(%arg0: i32, %arg1: i32) -> (i32, i32) {
    %c0_i32 = arith.constant 0 : i32
    %c0_i32_0 = arith.constant 0 : i32
    %c0_i32_1 = arith.constant 0 : i32
    return %c0_i32, %c0_i32_0 : i32, i32
  }
  func.func @transform_7(%arg0: i32, %arg1: i32) -> (i32, i32, i32, i32) {
    %c0_i32 = arith.constant 0 : i32
    %c0_i32_0 = arith.constant 0 : i32
    %c0_i32_1 = arith.constant 0 : i32
    return %arg0, %arg1, %c0_i32, %c0_i32_0 : i32, i32, i32, i32
  }
}

</mosaic_0001>

<bundles_post_ra>
// kernel: us_forward.1
= control target key start
LH: loop header
LB: loop body
LE: loop exit
PB: predicated region body
PF: predicated region fallthrough
CT: control target
= control target key end

     0   :  { %s2087_s24 = smov 0   ;;  %s2089_s25 = smov 0   ;;  %s2653_s0 = inlined_call_operand.vmem [shape: bf16[2,22,16,32], index: 0, kind: input, shape index: {}]   ;;  %s2654_s1 = inlined_call_operand.vmem [shape: bf16[32,32], index: 1, kind: input, shape index: {}]   ;;  %s2655_s2 = inlined_call_operand.vmem [shape: f32[1,32], index: 2, kind: input, shape index: {}]   ;;  %s2656_s3 = inlined_call_operand.vmem [shape: bf16[32,32], index: 3, kind: input, shape index: {}]   ;;  %s2657_s4 = inlined_call_operand.vmem [shape: f32[1,32], index: 4, kind: input, shape index: {}]   ;;  %s2658_s5 = inlined_call_operand.vmem [shape: bf16[288,128], index: 5, kind: input, shape index: {}]   ;;  %s2659_s6 = inlined_call_operand.vmem [shape: f32[1,128], index: 6, kind: input, shape index: {}]   ;;  %s2660_s7 = inlined_call_operand.vmem [shape: f32[2,20,16,128], index: 7, kind: output, shape index: {}]  }
   0x1   :  { %s2091_s26 = smov 0   ;;  %s2093_s27 = smov 0  }
   0x2   :  { %s2095_s28 = smov 0  }
   0x3 LB: > { %s26_s29 = sadd.s32 1, %s2032_s26  ;;  %s29_s30 = sadd.s32 1, %s2036_s27  ;;  %s2040_s28 = sphi %s2095_s28, %s17_s28   ;;  %s2036_s27 = sphi %s2093_s27, %s2676_s27   ;;  %s2032_s26 = sphi %s2091_s26, %s2675_s26   ;;  %s2028_s25 = sphi %s2089_s25, %s2674_s25   ;;  %s2024_s24 = sphi %s2087_s24, %s2673_s24  }
   0x4   : > { %p27_p0 = scmp.ge.s32.totalorder %s26_s29, 4  ;;  %p1636_p1 = scmp.ge.s32.totalorder %s2040_s28, 1 }
   0x5   : > { %p251_p2 = scmp.lt.s32.totalorder %s2040_s28, 9 }
   0x6   : > { %s2678_s29 = smov (%p27_p0, %s26_s29), 0  ;;  %s2680_s30 = smov (!%p27_p0, %s29_s30), %s2036_s27 }
   0x7   : > { %p252_p3 = pnand %p1636_p1, %p251_p2  ;;  %p31_p4 = scmp.ge.s32.totalorder %s2680_s30, 2 }
   0x8   : > { %p288_p5 = scmp.lt.s32.totalorder (!%p252_p3), %s2028_s25, 1  ;;  %s1710_s12 = smul.u32 (!%p252_p3), 40, %s2024_s24 }
   0x9   : > { %s2682_s30 = smov (%p31_p4, %s2680_s30), 0  ;;  %255 = sbr.rel (%p252_p3) target bundleno = 866 (0x362), region = 48 }
   0xa   : > { %s2292_s14 = smul.u32 (!%p252_p3), 5, %s2024_s24  ;;  %s2044_s23 = smov (!%p252_p3), 64  }
   0xc   : > { %s1683_s15 = sadd.s32 (!%p252_p3), 4294967295, %s2292_s14  ;;  %p296_p6 = scmp.lt.s32.totalorder (!%p252_p3), %s2292_s14, 19 }
   0xe   : > { %v1917_v0 = vld [vmem:[%s2654_s1 + $0x8] sm:$0xff]   ;;  %v2042_v1 = vmov 0.0   ;;  %v1918_v2 = vld [vmem:[%s2654_s1] sm:$0xff]   ;;  %vm2043_vm0 = vmmov 0   ;;  %s2684_s25 = smov (!%p288_p5, %s2028_s25), 1  ;;  %vm381_vm1 = vcmask 261120  }
   0xf   : > { %1782 = vmatprep.subr.bf16.mxu0 %v2042_v1  ;;  %1814 = vmatprep.subr.bf16.mxu1 %v2042_v1  ;;  %s1870_s13 = smul.u32 176, %s2684_s25  ;;  %v1926_v10 = vld [vmem:[%s2656_s3 + $0x8] sm:$0xff]   ;;  %v1927_v11 = vld [vmem:[%s2656_s3] sm:$0xff]   ;;  %s2686_s14 = smov (!%p296_p6, %s2292_s14), 19 }
  0x10   : > { %1783 = vmatpush3.bf16.msra.mxu0 %v1917_v0  ;;  %1786 = vmatprep.mubr.msk.bf16.mxu0 %vm2043_vm0, %v2042_v1  ;;  %v2169_v12 = vld [vmem:[%s2655_s2] ss:$0 sm:$0xff]  ;;  %s1871_s18 = smul.u32 40, %s2684_s25  ;;  %s1638_s19 = sshll.u32 %s2686_s14, 1 }
  0x11   : > { %1784 = vmatprep.subr.bf16.mxu0 %v2042_v1  ;;  %1818 = vmatprep.mubr.msk.bf16.mxu1 %vm2043_vm0, %v2042_v1  ;;  %s292_s16 = scalar_lea.vmem %s2653_s0, %s1870_s13 }
  0x12   : > { %s308_s17 = scalar_lea.vmem %s292_s16, %s1710_s12  ;;  %1815 = vmatpush3.bf16.msra.mxu1 %v1926_v10  ;;  %s2045_s12 = smov 32  }
  0x13   : > { %v1919_v3 = vld [vmem:[%s308_s17] sm:$0xff]   ;;  %v1920_v4 = vld [vmem:[%s308_s17 + $0x8] sm:$0xff]   ;;  %v1921_v5 = vld [vmem:[%s308_s17 + $0x10] sm:$0xff]   ;;  %1816 = vmatprep.subr.bf16.mxu1 %v2042_v1  ;;  %s300_s22 = sadd.s32 %s1871_s18, %s1638_s19 }
  0x14   : > { %1785 = vmatpush3.bf16.msra.mxu0 %v1918_v2  ;;  %v1922_v6 = vld [vmem:[%s308_s17 + $0x18] sm:$0xff]   ;;  %v1923_v7 = vld [vmem:[%s308_s17 + $0x20] sm:$0xff]   ;;  %v1924_v8 = vld [vmem:[%s308_s17 + $0x28] sm:$0xff]  }
  0x15   : > { %v1925_v9 = vld [vmem:[%s308_s17 + $0x30] sm:$0xff]   ;;  %s2046_s17 = smov 96  }
  0x16   : > { %1817 = vmatpush3.bf16.msra.mxu1 %v1927_v11 }
  0x17   : > { %1787 = vmatmul.mubr.msk.bf16.vlgmr.msra.gmra.mxu0 %vm381_vm1, %v1919_v3  ;;  %1846 = vmatprep.subr.bf16.mxu1 %v2042_v1 }
  0x18   : > { %1790 = vmatprep.mubr.msk.bf16.mxu0 %vm2043_vm0, %v2042_v1 }
  0x1f   : > { %1791 = vmatmul.mubr.msk.bf16.gmra.mxu0 %vm381_vm1, %v1920_v4 }
  0x20   : > { %1794 = vmatprep.mubr.msk.bf16.mxu0 %vm2043_vm0, %v2042_v1 }
  0x27   : > { %1795 = vmatmul.mubr.msk.bf16.gmra.mxu0 %vm381_vm1, %v1921_v5 }
  0x28   : > { %1798 = vmatprep.mubr.msk.bf16.mxu0 %vm2043_vm0, %v2042_v1 }
  0x2f   : > { %1799 = vmatmul.mubr.msk.bf16.gmra.mxu0 %vm381_vm1, %v1922_v6 }
  0x30   : > { %1802 = vmatprep.mubr.msk.bf16.mxu0 %vm2043_vm0, %v2042_v1 }
  0x37   : > { %1803 = vmatmul.mubr.msk.bf16.gmra.mxu0 %vm381_vm1, %v1923_v7 }
  0x38   : > { %1806 = vmatprep.mubr.msk.bf16.mxu0 %vm2043_vm0, %v2042_v1 }
  0x3f   : > { %1807 = vmatmul.mubr.msk.bf16.gmra.mxu0 %vm381_vm1, %v1924_v8 }
  0x40   : > { %1810 = vmatprep.mubr.msk.bf16.mxu0 %vm2043_vm0, %v2042_v1 }
  0x47   : > { %1811 = vmatmul.mubr.msk.bf16.gmra.mxu0 %vm381_vm1, %v1925_v9 }
  0xd7   : > { %v437_v13 = vpop.f32.mrf.mxu0 }
  0xd8   : > { %v438_v14 = vadd.f32 %v2169_v12, %v437_v13 }
  0xd9   : > { %v1788_v15 = vpop.f32.mrf.mxu0 }
  0xda   : > { %v506_v17 = vmul.f32 0.2, %v438_v14  ;;  %vm492_vm2 = vcmp.ge.f32.partialorder %v438_v14, 0.0 }
  0xdb   : > { %v440_v16 = vpop.f32.mrf.mxu0 }
  0xdc   : > { %v441_v18 = vadd.f32 %v2169_v12, %v440_v16  ;;  %v2173_v22 = vsel %vm492_vm2, %v438_v14, %v506_v17 }
  0xdd   : > { %v1789_v19 = vpop.f32.mrf.mxu0 }
  0xde   : > { %vm493_vm3 = vcmp.ge.f32.partialorder %v441_v18, 0.0  ;;  %v507_v20 = vmul.f32 0.2, %v441_v18 }
  0xdf   : > { %v445_v21 = vpop.f32.mrf.mxu0 }
  0xe0   : > { %v2175_v23 = vsel %vm493_vm3, %v441_v18, %v507_v20  ;;  %v446_v24 = vadd.f32 %v2169_v12, %v445_v21 }
  0xe1   : > { %v534_v25 = vpack.c.bf16 %v2175_v23, %v2173_v22  ;;  %v1792_v26 = vpop.f32.mrf.mxu0 }
  0xe2   : > { %v508_v28 = vmul.f32 0.2, %v446_v24  ;;  %vm494_vm4 = vcmp.ge.f32.partialorder %v446_v24, 0.0 }
  0xe3   : > { %v448_v27 = vpop.f32.mrf.mxu0  ;;  %1819 = vmatmul.mubr.msk.bf16.vlgmr.msra.gmra.mxu1 %vm381_vm1, %v534_v25 }
  0xe4   : > { %v449_v29 = vadd.f32 %v2169_v12, %v448_v27  ;;  %1822 = vmatprep.mubr.msk.bf16.mxu1 %vm2043_vm0, %v2042_v1  ;;  %v2184_v33 = vsel %vm494_vm4, %v446_v24, %v508_v28 }
  0xe5   : > { %v1793_v30 = vpop.f32.mrf.mxu0 }
  0xe6   : > { %vm495_vm5 = vcmp.ge.f32.partialorder %v449_v29, 0.0  ;;  %v509_v31 = vmul.f32 0.2, %v449_v29  ;;  %v1929_v30 = vld [vmem:[%s2658_s5 + $0x80] sm:$0xff]  }
  0xe7   : > { %v453_v32 = vpop.f32.mrf.mxu0 }
  0xe8   : > { %v2186_v34 = vsel %vm495_vm5, %v449_v29, %v509_v31  ;;  %v454_v35 = vadd.f32 %v2169_v12, %v453_v32  ;;  %v1930_v31 = vld [vmem:[%s2658_s5 + $0x78] sm:$0xff]   ;;  %vm913_vm5 = vcmask 1040384  }
  0xe9   : > { %v535_v36 = vpack.c.bf16 %v2186_v34, %v2184_v33  ;;  %v1796_v37 = vpop.f32.mrf.mxu0  ;;  %v1931_v32 = vld [vmem:[%s2658_s5 + $0x38] sm:$0xff]   ;;  %1729 = vmatprep.subr.bf16.mxu0 %v1930_v31 }
  0xea   : > { %v510_v39 = vmul.f32 0.2, %v454_v35  ;;  %vm496_vm6 = vcmp.ge.f32.partialorder %v454_v35, 0.0  ;;  %1730 = vmatpush3.bf16.msra.mxu0 %v1931_v32  ;;  %v2270_v37 = vld [vmem:[%s2657_s4] ss:$0 sm:$0xff] }
  0xeb   : > { %v456_v38 = vpop.f32.mrf.mxu0  ;;  %1823 = vmatmul.mubr.msk.bf16.gmra.mxu1 %vm381_vm1, %v535_v36  ;;  %v1933_v36 = vld [vmem:[%s2658_s5 + $0x30] sm:$0xff]  }
  0xec   : > { %v457_v40 = vadd.f32 %v2169_v12, %v456_v38  ;;  %1826 = vmatprep.mubr.msk.bf16.mxu1 %vm2043_vm0, %v2042_v1  ;;  %v2195_v44 = vsel %vm496_vm6, %v454_v35, %v510_v39  ;;  %v1932_v35 = vld [vmem:[%s2658_s5 + $0x70] sm:$0xff]   ;;  %v1934_v38 = vld [vmem:[%s2658_s5 + $0x68] sm:$0xff]   ;;  %vm914_vm6 = vsmask.f32 256 }
  0xed   : > { %v1797_v41 = vpop.f32.mrf.mxu0  ;;  %1731 = vmatprep.subr.bf16.mxu0 %v1932_v35 }
  0xee   : > { %vm497_vm7 = vcmp.ge.f32.partialorder %v457_v40, 0.0  ;;  %v511_v42 = vmul.f32 0.2, %v457_v40  ;;  %1732 = vmatpush3.bf16.msra.mxu0 %v1933_v36  ;;  %v1935_v41 = vld [vmem:[%s2658_s5 + $0x28] sm:$0xff]  }
  0xef   : > { %v461_v43 = vpop.f32.mrf.mxu0  ;;  %1733 = vmatprep.subr.bf16.mxu0 %v1934_v38  ;;  %v2297_v38 = vstv %s1683_s15 }
  0xf0   : > { %v2197_v45 = vsel %vm497_vm7, %v457_v40, %v511_v42  ;;  %v462_v46 = vadd.f32 %v2169_v12, %v461_v43  ;;  %v1936_v43 = vld [vmem:[%s2658_s5 + $0x60] sm:$0xff]   ;;  %vm794_vm2 = vcmp.ge.s32.totalorder %v2297_v38, 0  ;;  %vm801_vm3 = vcmp.lt.s32.totalorder %v2297_v38, 16 }
  0xf1   : > { %v536_v47 = vpack.c.bf16 %v2197_v45, %v2195_v44  ;;  %v1800_v48 = vpop.f32.mrf.mxu0  ;;  %vm808_vm4 = vmand %vm794_vm2, %vm801_vm3 }
  0xf2   : > { %v512_v50 = vmul.f32 0.2, %v462_v46  ;;  %vm498_vm8 = vcmp.ge.f32.partialorder %v462_v46, 0.0  ;;  %1734 = vmatpush3.bf16.msra.mxu0 %v1935_v41 }
  0xf3   : > { %v464_v49 = vpop.f32.mrf.mxu0  ;;  %1827 = vmatmul.mubr.msk.bf16.gmra.mxu1 %vm381_vm1, %v536_v47  ;;  %1735 = vmatprep.subr.bf16.mxu0 %v1936_v43 }
  0xf4   : > { %v465_v51 = vadd.f32 %v2169_v12, %v464_v49  ;;  %1830 = vmatprep.mubr.msk.bf16.mxu1 %vm2043_vm0, %v2042_v1  ;;  %v2206_v55 = vsel %vm498_vm8, %v462_v46, %v512_v50  ;;  %v1937_v49 = vld [vmem:[%s2658_s5 + $0x20] sm:$0xff]  }
  0xf5   : > { %v1801_v52 = vpop.f32.mrf.mxu0 }
  0xf6   : > { %vm499_vm9 = vcmp.ge.f32.partialorder %v465_v51, 0.0  ;;  %v513_v53 = vmul.f32 0.2, %v465_v51  ;;  %1736 = vmatpush3.bf16.msra.mxu0 %v1937_v49 }
  0xf7   : > { %v469_v54 = vpop.f32.mrf.mxu0 }
  0xf8   : > { %v2208_v56 = vsel %vm499_vm9, %v465_v51, %v513_v53  ;;  %v470_v57 = vadd.f32 %v2169_v12, %v469_v54  ;;  %vm2311_vm9 = vmand %vm913_vm5, %vm914_vm6 }
  0xf9   : > { %v537_v58 = vpack.c.bf16 %v2208_v56, %v2206_v55  ;;  %v1804_v59 = vpop.f32.mrf.mxu0 }
  0xfa   : > { %v514_v60 = vmul.f32 0.2, %v470_v57  ;;  %vm500_vm10 = vcmp.ge.f32.partialorder %v470_v57, 0.0 }
  0xfb   : > { %v472_v61 = vpop.f32.mrf.mxu0  ;;  %1831 = vmatmul.mubr.msk.bf16.gmra.mxu1 %vm381_vm1, %v537_v58 }
  0xfc   : > { %v473_v62 = vadd.f32 %v2169_v12, %v472_v61  ;;  %1834 = vmatprep.mubr.msk.bf16.mxu1 %vm2043_vm0, %v2042_v1  ;;  %v2217_v0 = vsel %vm500_vm10, %v470_v57, %v514_v60 }
  0xfd   : > { %v1805_v63 = vpop.f32.mrf.mxu0 }
  0xfe   : > { %vm501_vm11 = vcmp.ge.f32.partialorder %v473_v62, 0.0  ;;  %v515_v2 = vmul.f32 0.2, %v473_v62 }
  0xff   : > { %v477_v3 = vpop.f32.mrf.mxu0 }
 0x100   : > { %v2219_v4 = vsel %vm501_vm11, %v473_v62, %v515_v2  ;;  %v478_v5 = vadd.f32 %v2169_v12, %v477_v3  ;;  %vm1001_vm11 = vcmask 1046528  }
 0x101   : > { %v538_v6 = vpack.c.bf16 %v2219_v4, %v2217_v0  ;;  %v1808_v7 = vpop.f32.mrf.mxu0 }
 0x102   : > { %v516_v8 = vmul.f32 0.2, %v478_v5  ;;  %vm502_vm12 = vcmp.ge.f32.partialorder %v478_v5, 0.0 }
 0x103   : > { %v480_v9 = vpop.f32.mrf.mxu0  ;;  %1835 = vmatmul.mubr.msk.bf16.gmra.mxu1 %vm381_vm1, %v538_v6 }
 0x104   : > { %v481_v10 = vadd.f32 %v2169_v12, %v480_v9  ;;  %1838 = vmatprep.mubr.msk.bf16.mxu1 %vm2043_vm0, %v2042_v1  ;;  %v2228_v13 = vsel %vm502_vm12, %v478_v5, %v516_v8 }
 0x105   : > { %v1809_v11 = vpop.f32.mrf.mxu0 }
 0x106   : > { %vm503_vm13 = vcmp.ge.f32.partialorder %v481_v10, 0.0  ;;  %v517_v14 = vmul.f32 0.2, %v481_v10 }
 0x107   : > { %v485_v15 = vpop.f32.mrf.mxu0 }
 0x108   : > { %v2230_v16 = vsel %vm503_vm13, %v481_v10, %v517_v14  ;;  %v486_v17 = vadd.f32 %v2169_v12, %v485_v15 }
 0x109   : > { %v539_v18 = vpack.c.bf16 %v2230_v16, %v2228_v13  ;;  %v1812_v19 = vpop.f32.mrf.mxu0 }
 0x10a   : > { %v518_v20 = vmul.f32 0.2, %v486_v17  ;;  %vm504_vm14 = vcmp.ge.f32.partialorder %v486_v17, 0.0 }
 0x10b   : > { %v488_v21 = vpop.f32.mrf.mxu0  ;;  %1839 = vmatmul.mubr.msk.bf16.gmra.mxu1 %vm381_vm1, %v539_v18 }
 0x10c   : > { %v489_v24 = vadd.f32 %v2169_v12, %v488_v21  ;;  %1842 = vmatprep.mubr.msk.bf16.mxu1 %vm2043_vm0, %v2042_v1  ;;  %v2239_v26 = vsel %vm504_vm14, %v486_v17, %v518_v20  ;;  %v1928_v12 = vld [vmem:[%s2658_s5 + $0x88] sm:$0xff]   ;;  %vm930_vm14 = vsmask.f32 7424 }
 0x10d   : > { %v1813_v25 = vpop.f32.mrf.mxu0  ;;  %1847 = vmatpush3.bf16.msra.mxu1 %v1928_v12 }
 0x10e   : > { %vm505_vm15 = vcmp.ge.f32.partialorder %v489_v24, 0.0  ;;  %v519_v27 = vmul.f32 0.2, %v489_v24  ;;  %1848 = vmatprep.subr.bf16.mxu1 %v2042_v1 }
 0x110   : > { %v2241_v28 = vsel %vm505_vm15, %v489_v24, %v519_v27 }
 0x111   : > { %v540_v29 = vpack.c.bf16 %v2241_v28, %v2239_v26  ;;  %1849 = vmatpush3.bf16.msra.mxu1 %v1929_v30 }
 0x113   : > { %1843 = vmatmul.mubr.msk.bf16.gmra.mxu1 %vm381_vm1, %v540_v29 }
 0x114   : > { %1850 = vmatprep.mubr.msk.bf16.mxu1 %vm2043_vm0, %v2042_v1 }
 0x1a3   : > { %v619_v39 = vpop.f32.mrf.mxu1 }
 0x1a4   : > { %v620_v40 = vadd.f32 %v2270_v37, %v619_v39 }
 0x1a5   : > { %v1820_v42 = vpop.f32.mrf.mxu1 }
 0x1a6   : > { %v1669_v46 = vmul.f32 -1.442695, %v620_v40 }
 0x1a7   : > { %v622_v47 = vpop.f32.mrf.mxu1 }
 0x1a8   : > { %1946 = vpow2.f32 %v1669_v46  ;;  %v623_v48 = vadd.f32 %v2270_v37, %v622_v47 }
 0x1a9   : > { %v1821_v50 = vpop.f32.mrf.mxu1 }
 0x1aa   : > { %v1670_v51 = vmul.f32 -1.442695, %v623_v48 }
 0x1ab   : > { %v627_v52 = vpop.f32.mrf.mxu1 }
 0x1ac   : > { %1948 = vpow2.f32 %v1670_v51  ;;  %v628_v53 = vadd.f32 %v2270_v37, %v627_v52 }
 0x1ad   : > { %v1824_v54 = vpop.f32.mrf.mxu1 }
 0x1ae   : > { %v1671_v57 = vmul.f32 -1.442695, %v628_v53 }
 0x1af   : > { %v630_v58 = vpop.f32.mrf.mxu1 }
 0x1b0   : > { %1950 = vpow2.f32 %v1671_v57  ;;  %v631_v59 = vadd.f32 %v2270_v37, %v630_v58 }
 0x1b1   : > { %v1825_v60 = vpop.f32.mrf.mxu1 }
 0x1b2   : > { %v1672_v61 = vmul.f32 -1.442695, %v631_v59  ;;  %v788_v59 = vadd.s32 1, %v2297_v38 }
 0x1b3   : > { %v635_v62 = vpop.f32.mrf.mxu1 }
 0x1b4   : > { %1952 = vpow2.f32 %v1672_v61  ;;  %v636_v63 = vadd.f32 %v2270_v37, %v635_v62  ;;  %vm795_vm7 = vcmp.ge.s32.totalorder %v788_v59, 0  ;;  %vm802_vm8 = vcmp.lt.s32.totalorder %v788_v59, 16 }
 0x1b5   : > { %v1947_v2 = vpop.eup %1946  ;;  %v1828_v3 = vpop.f32.mrf.mxu1  ;;  %vm2319_vm10 = vmand %vm795_vm7, %vm802_vm8 }
 0x1b6   : > { %v716_v5 = vadd.f32 1.0, %v1947_v2  ;;  %v1673_v6 = vmul.f32 -1.442695, %v636_v63 }
 0x1b7   : > { %v638_v7 = vpop.f32.mrf.mxu1 }
 0x1b8   : > { %1954 = vrcp.f32 %v716_v5  ;;  %v639_v8 = vadd.f32 %v2270_v37, %v638_v7 }
 0x1b9   : > { %v1949_v9 = vpop.eup %1948  ;;  %1956 = vpow2.f32 %v1673_v6  ;;  %v1829_v10 = vpop.f32.mrf.mxu1 }
 0x1ba   : > { %v717_v11 = vadd.f32 1.0, %v1949_v9  ;;  %v1674_v14 = vmul.f32 -1.442695, %v639_v8 }
 0x1bb   : > { %v643_v15 = vpop.f32.mrf.mxu1 }
 0x1bc   : > { %1958 = vrcp.f32 %v717_v11  ;;  %v644_v17 = vadd.f32 %v2270_v37, %v643_v15  ;;  %v789_v11 = vadd.s32 2, %v2297_v38 }
 0x1bd   : > { %v1951_v18 = vpop.eup %1950  ;;  %1960 = vpow2.f32 %v1674_v14  ;;  %v1832_v19 = vpop.f32.mrf.mxu1 }
 0x1be   : > { %v718_v20 = vadd.f32 1.0, %v1951_v18  ;;  %v1675_v21 = vmul.f32 -1.442695, %v644_v17  ;;  %vm796_vm12 = vcmp.ge.s32.totalorder %v789_v11, 0  ;;  %vm803_vm13 = vcmp.lt.s32.totalorder %v789_v11, 16  ;;  %v1942_v11 = vld [vmem:[%s2658_s5 + $0x48] sm:$0xff]  }
 0x1bf   : > { %v646_v24 = vpop.f32.mrf.mxu1  ;;  %vm2358_vm15 = vmand %vm796_vm12, %vm803_vm13 }
 0x1c0   : > { %1962 = vrcp.f32 %v718_v20  ;;  %v647_v25 = vadd.f32 %v2270_v37, %v646_v24 }
 0x1c1   : > { %v1953_v27 = vpop.eup %1952  ;;  %1964 = vpow2.f32 %v1675_v21  ;;  %v1833_v29 = vpop.f32.mrf.mxu1 }
 0x1c2   : > { %v719_v12 = vadd.f32 1.0, %v1953_v27  ;;  %v1676_v30 = vmul.f32 -1.442695, %v647_v25 }
 0x1c3   : > { %v651_v31 = vpop.f32.mrf.mxu1 }
 0x1c4   : > { %1966 = vrcp.f32 %v719_v12  ;;  %v652_v32 = vadd.f32 %v2270_v37, %v651_v31 }
 0x1c5   : > { %v1955_v35 = vpop.eup %1954  ;;  %1968 = vpow2.f32 %v1676_v30  ;;  %v1836_v36 = vpop.f32.mrf.mxu1 }
 0x1c6   : > { %v1957_v39 = vpop.eup %1956  ;;  %v1677_v40 = vmul.f32 -1.442695, %v652_v32  ;;  %v758_v41 = vmul.f32 %v1955_v35, %v2173_v22  ;;  %v1938_v35 = vld [vmem:[%s2658_s5 + $0x58] sm:$0xff]  }
 0x1c7   : > { %v720_v42 = vadd.f32 1.0, %v1957_v39  ;;  %v654_v43 = vpop.f32.mrf.mxu1  ;;  %v1939_v36 = vld [vmem:[%s2658_s5 + $0x18] sm:$0xff]   ;;  %1737 = vmatprep.subr.bf16.mxu0 %v1938_v35 }
 0x1c8   : > { %1970 = vpow2.f32 %v1677_v40  ;;  %v655_v46 = vadd.f32 %v2270_v37, %v654_v43  ;;  %v772_v52 = vadd.f32 %v758_v41, %v2173_v22  ;;  %1738 = vmatpush3.bf16.msra.mxu0 %v1939_v36 }
 0x1c9   : > { %v1959_v47 = vpop.eup %1958  ;;  %1972 = vrcp.f32 %v720_v42  ;;  %v1837_v48 = vpop.f32.mrf.mxu1 }
 0x1ca   : > { %v1961_v49 = vpop.eup %1960  ;;  %v1678_v50 = vmul.f32 -1.442695, %v655_v46  ;;  %v759_v51 = vmul.f32 %v1959_v47, %v2175_v23  ;;  %v829_v2 = vsel %vm808_vm4, %v772_v52, 0.0  ;;  %v1940_v52 = vld [vmem:[%s2658_s5 + $0x50] sm:$0xff]  }
 0x1cb   : > { %v721_v53 = vadd.f32 1.0, %v1961_v49  ;;  %v659_v54 = vpop.f32.mrf.mxu1  ;;  %1739 = vmatprep.subr.bf16.mxu0 %v1940_v52 }
 0x1cc   : > { %1974 = vpow2.f32 %v1678_v50  ;;  %v660_v57 = vadd.f32 %v2270_v37, %v659_v54  ;;  %v773_v58 = vadd.f32 %v759_v51, %v2175_v23 }
 0x1cd   : > { %v1963_v60 = vpop.eup %1962  ;;  %1976 = vrcp.f32 %v721_v53  ;;  %v1840_v61 = vpop.f32.mrf.mxu1  ;;  %v1941_v53 = vld [vmem:[%s2658_s5 + $0x10] sm:$0xff]  }
 0x1ce   : > { %v1965_v62 = vpop.eup %1964  ;;  %v1679_v63 = vmul.f32 -1.442695, %v660_v57  ;;  %v830_v3 = vsel %vm808_vm4, %v773_v58, 0.0  ;;  %v760_v5 = vmul.f32 %v1963_v60, %v2184_v33  ;;  %1740 = vmatpush3.bf16.msra.mxu0 %v1941_v53 }
 0x1cf   : > { %v722_v22 = vadd.f32 1.0, %v1965_v62  ;;  %v662_v6 = vpop.f32.mrf.mxu1  ;;  %v843_v7 = vpack.c.bf16 %v830_v3, %v829_v2  ;;  %1741 = vmatprep.subr.bf16.mxu0 %v1942_v11 }
 0x1d0   : > { %1978 = vpow2.f32 %v1679_v63  ;;  %v663_v8 = vadd.f32 %v2270_v37, %v662_v6  ;;  %v774_v19 = vadd.f32 %v760_v5, %v2184_v33 }
 0x1d1   : > { %v1967_v23 = vpop.eup %1966  ;;  %1980 = vrcp.f32 %v722_v22  ;;  %v1841_v9 = vpop.f32.mrf.mxu1  ;;  %v851_v10 = vshrl.u32 %v843_v7, 16  ;;  %v854_v25 = vshll.u32 %v843_v7, 16 }
 0x1d2   : > { %v1969_v14 = vpop.eup %1968  ;;  %v1680_v15 = vmul.f32 -1.442695, %v663_v8  ;;  %v761_v18 = vmul.f32 %v1967_v23, %v2186_v34 }
 0x1d3   : > { %v723_v20 = vadd.f32 1.0, %v1969_v14  ;;  %v667_v21 = vpop.f32.mrf.mxu1  ;;  %v853_v24 = vrot.slane %v851_v10, 7 }
 0x1d4   : > { %1982 = vpow2.f32 %v1680_v15  ;;  %v668_v29 = vadd.f32 %v2270_v37, %v667_v21  ;;  %v775_v12 = vadd.f32 %v761_v18, %v2186_v34  ;;  %v831_v34 = vsel %vm2319_vm10, %v774_v19, 0.0  ;;  %v1943_v15 = vld [vmem:[%s2658_s5 + $0x8] sm:$0xff]  }
 0x1d5   : > { %v1971_v30 = vpop.eup %1970  ;;  %1984 = vrcp.f32 %v723_v20  ;;  %v1844_v31 = vpop.f32.mrf.mxu1  ;;  %v856_v33 = vor.u32 %v854_v25, %v853_v24  ;;  %v923_v32 = vsel %vm2311_vm9, %v853_v24, 0  ;;  %1742 = vmatpush3.bf16.msra.mxu0 %v1943_v15 }
 0x1d6   : > { %v1973_v39 = vpop.eup %1972  ;;  %v724_v40 = vadd.f32 1.0, %v1971_v30  ;;  %v1681_v41 = vmul.f32 -1.442695, %v668_v29  ;;  %v1003_v46 = vrot.slane %v923_v32, 1  ;;  %v832_v47 = vsel %vm2319_vm10, %v775_v12, 0.0 }
 0x1d7   : > { %v670_v42 = vpop.f32.mrf.mxu1  ;;  %v2337_v43 = vsel %vm2311_vm9, 0, %v856_v33  ;;  %v762_v48 = vmul.f32 %v1973_v39, %v2195_v44  ;;  %v939_v51 = vshll.u32 %v923_v32, 16  ;;  %v844_v59 = vpack.c.bf16 %v832_v47, %v831_v34  ;;  %v1944_v33 = vld [vmem:[%s2658_s5 + $0x40] sm:$0xff]  }
 0x1d8   : > { %1986 = vrcp.f32 %v724_v40  ;;  %v671_v49 = vadd.f32 %v2270_v37, %v670_v42  ;;  %v1002_v50 = vrot.slane %v2337_v43, 1  ;;  %v934_v58 = vshll.u32 %v2337_v43, 16  ;;  %v1945_v32 = vld [vmem:[%s2658_s5] sm:$0xff]   ;;  %1743 = vmatprep.subr.bf16.mxu0 %v1944_v33 }
 0x1d9   : > { %v1975_v54 = vpop.eup %1974  ;;  %1988 = vpow2.f32 %v1681_v41  ;;  %v1845_v57 = vpop.f32.mrf.mxu1  ;;  %v776_v63 = vadd.f32 %v762_v48, %v2195_v44  ;;  %v932_v2 = vshrl.u32 %v2337_v43, 16  ;;  %v858_v5 = vshrl.u32 %v844_v59, 16  ;;  %1744 = vmatpush3.bf16.msra.mxu0 %v1945_v32 }
 0x1da   : > { %v1977_v37 = vpop.eup %1976  ;;  %v725_v60 = vadd.f32 1.0, %v1975_v54  ;;  %v1682_v61 = vmul.f32 -1.442695, %v671_v49  ;;  %v1004_v62 = vsel %vm1001_vm11, %v1002_v50, %v1003_v46  ;;  %v936_v3 = vrot.slane %v934_v58, 1 }
 0x1db   : > { %1061 = vrot.lane.b32.xlu1 %v1004_v62, %s2044_s23  ;;  %v763_v22 = vmul.f32 %v1977_v37, %v2197_v45  ;;  %v941_v7 = vrot.slane %v939_v51, 1  ;;  %v861_v8 = vshll.u32 %v844_v59, 16  ;;  %v790_v44 = vadd.s32 3, %v2297_v38 }
 0x1dc   : > { %1990 = vrcp.f32 %v725_v60  ;;  %v937_v9 = vor.u32 %v936_v3, %v932_v2  ;;  %v860_v10 = vrot.slane %v858_v5, 7  ;;  %v833_v20 = vsel %vm2358_vm15, %v776_v63, 0.0 }
 0x1dd   : > { %v1979_v23 = vpop.eup %1978  ;;  %1992 = vpow2.f32 %v1682_v61  ;;  %v777_v14 = vadd.f32 %v763_v22, %v2197_v45  ;;  %vm797_vm2 = vcmp.ge.s32.totalorder %v790_v44, 0  ;;  %vm804_vm3 = vcmp.lt.s32.totalorder %v790_v44, 16 }
 0x1de   : > { %v1981_v18 = vpop.eup %1980  ;;  %v726_v19 = vadd.f32 1.0, %v1979_v23  ;;  %v942_v21 = vsel %vm930_vm14, %v937_v9, %v941_v7  ;;  %v863_v24 = vor.u32 %v861_v8, %v860_v10  ;;  %v924_v25 = vsel %vm2311_vm9, %v860_v10, 0  ;;  %vm2397_vm4 = vmand %vm797_vm2, %vm804_vm3 }
 0x1df   : > { %v834_v45 = vsel %vm2358_vm15, %v777_v14, 0.0  ;;  %1051 = vrot.lane.b32.xlu0 %v942_v21, %s2045_s12  ;;  %v1006_v30 = vrot.slane %v924_v25, 1  ;;  %v764_v31 = vmul.f32 %v1981_v18, %v2206_v55  ;;  %v951_v41 = vshll.u32 %v924_v25, 16 }
 0x1e0   : > { %1994 = vrcp.f32 %v726_v19  ;;  %v845_v27 = vpack.c.bf16 %v834_v45, %v833_v20  ;;  %v2380_v12 = vsel %vm2311_vm9, 0, %v863_v24  ;;  %v791_v57 = vadd.s32 4, %v2297_v38 }
 0x1e1   : > { %v1983_v29 = vpop.eup %1982  ;;  %1071 = vrot.lane.b32.xlu1 %v2380_v12, %s2046_s17  ;;  %v1005_v39 = vrot.slane %v2380_v12, 1  ;;  %v946_v40 = vshll.u32 %v2380_v12, 16  ;;  %v944_v34 = vshrl.u32 %v2380_v12, 16  ;;  %v778_v50 = vadd.f32 %v764_v31, %v2206_v55 }
 0x1e2   : > { %v1985_v35 = vpop.eup %1984  ;;  %v727_v36 = vadd.f32 1.0, %v1983_v29  ;;  %v865_v42 = vshrl.u32 %v845_v27, 16  ;;  %v868_v53 = vshll.u32 %v845_v27, 16  ;;  %v953_v37 = vrot.slane %v951_v41, 1 }
 0x1e3   : > { %v765_v46 = vmul.f32 %v1985_v35, %v2208_v56  ;;  %v1007_v48 = vsel %vm1001_vm11, %v1005_v39, %v1006_v30  ;;  %v948_v49 = vrot.slane %v946_v40, 1  ;;  %v835_v60 = vsel %vm2397_vm4, %v778_v50, 0.0 }
 0x1e4   : > { %1996 = vrcp.f32 %v727_v36  ;;  %1081 = vrot.lane.b32.xlu0 %v1007_v48, %s2045_s12  ;;  %v867_v52 = vrot.slane %v865_v42, 7  ;;  %vm798_vm5 = vcmp.ge.s32.totalorder %v791_v57, 0  ;;  %vm805_vm6 = vcmp.lt.s32.totalorder %v791_v57, 16 }
 0x1e5   : > { %v1987_v51 = vpop.eup %1986  ;;  %v779_v54 = vadd.f32 %v765_v46, %v2208_v56  ;;  %1063 = vrot.lane.b32.xlu1 %v1007_v48, %s2044_s23  ;;  %v949_v59 = vor.u32 %v948_v49, %v944_v34  ;;  %vm2430_vm7 = vmand %vm798_vm5, %vm805_vm6  ;;  %v792_v21 = vadd.s32 5, %v2297_v38 }
 0x1e6   : > { %v1989_v58 = vpop.eup %1988  ;;  %v766_v55 = vmul.f32 %v1987_v51, %v2217_v0  ;;  %v870_v62 = vor.u32 %v868_v53, %v867_v52  ;;  %v925_v63 = vsel %vm2311_vm9, %v867_v52, 0  ;;  %v793_v53 = vadd.s32 6, %v2297_v38 }
 0x1e7   : > { %v728_v61 = vadd.f32 1.0, %v1989_v58  ;;  %v836_v56 = vsel %vm2397_vm4, %v779_v54, 0.0  ;;  %v2415_v2 = vsel %vm930_vm14, %v949_v59, %v953_v37  ;;  %v1009_v8 = vrot.slane %v925_v63, 1 }
 0x1e8   : > { %v846_v3 = vpack.c.bf16 %v836_v56, %v835_v60  ;;  %v2419_v22 = vsel %vm2311_vm9, 0, %v870_v62  ;;  %v963_v23 = vshll.u32 %v925_v63, 16  ;;  %v780_v11 = vadd.f32 %v766_v55, %v2217_v0 }
 0x1e9   : > { %v1991_v5 = vpop.eup %1990  ;;  %1998 = vrcp.f32 %v728_v61  ;;  %1053 = vrot.lane.b32.xlu1 %v2415_v2, %s2045_s12  ;;  %v1008_v7 = vrot.slane %v2419_v22, 1  ;;  %v958_v44 = vshll.u32 %v2419_v22, 16  ;;  %v956_v18 = vshrl.u32 %v2419_v22, 16 }
 0x1ea   : > { %v1993_v6 = vpop.eup %1992  ;;  %v872_v10 = vshrl.u32 %v846_v3, 16  ;;  %v767_v14 = vmul.f32 %v1991_v5, %v2219_v4  ;;  %v875_v0 = vshll.u32 %v846_v3, 16  ;;  %v965_v29 = vrot.slane %v963_v23, 1 }
 0x1eb   : > { %v729_v9 = vadd.f32 1.0, %v1993_v6  ;;  %v1010_v15 = vsel %vm1001_vm11, %v1008_v7, %v1009_v8  ;;  %v960_v19 = vrot.slane %v958_v44, 1  ;;  %v837_v32 = vsel %vm2430_vm7, %v780_v11, 0.0 }
 0x1ec   : > { %1083 = vrot.lane.b32.xlu0 %v1010_v15, %s2045_s12  ;;  %1851 = vmatmul.mubr.msk.bf16.vlgmr.msra.gmra.mxu1 %vm381_vm1, %v1010_v15  ;;  %v874_v25 = vrot.slane %v872_v10, 7  ;;  %v781_v45 = vadd.f32 %v767_v14, %v2219_v4  ;;  %vm799_vm8 = vcmp.ge.s32.totalorder %v792_v21, 0  ;;  %vm806_vm10 = vcmp.lt.s32.totalorder %v792_v21, 16 }
 0x1ed   : > { %v1995_v24 = vpop.eup %1994  ;;  %2000 = vrcp.f32 %v729_v9  ;;  %1091 = vrot.lane.b32.xlu1 %v2419_v22, %s2044_s23  ;;  %v961_v27 = vor.u32 %v960_v19, %v956_v18  ;;  %1854 = vmatprep.mubr.msk.bf16.mxu1 %vm2043_vm0, %v2042_v1  ;;  %vm2464_vm12 = vmand %vm799_vm8, %vm806_vm10  ;;  %vm800_vm13 = vcmp.ge.s32.totalorder %v793_v53, 0  ;;  %vm807_vm15 = vcmp.lt.s32.totalorder %v793_v53, 16 }
 0x1ee   : > { %v768_v30 = vmul.f32 %v1995_v24, %v2228_v13  ;;  %v877_v31 = vor.u32 %v875_v0, %v874_v25  ;;  %v926_v33 = vsel %vm2311_vm9, %v874_v25, 0  ;;  %v838_v4 = vsel %vm2430_vm7, %v781_v45, 0.0  ;;  %vm814_vm2 = vmand %vm800_vm13, %vm807_vm15 }
 0x1ef   : > { %v2450_v35 = vsel %vm930_vm14, %v961_v27, %v965_v29  ;;  %v847_v36 = vpack.c.bf16 %v838_v4, %v837_v32  ;;  %v1012_v34 = vrot.slane %v926_v33, 1 }
 0x1f0   : > { %1101 = vrot.lane.b32.xlu0 %v2450_v35, %s2046_s17  ;;  %v2456_v40 = vsel %vm2311_vm9, 0, %v877_v31  ;;  %v782_v46 = vadd.f32 %v768_v30, %v2228_v13  ;;  %v975_v13 = vshll.u32 %v926_v33, 16 }
 0x1f1   : > { %v1997_v39 = vpop.eup %1996  ;;  %1073 = vrot.lane.b32.xlu1 %v2419_v22, %s2046_s17  ;;  %v1011_v41 = vrot.slane %v2456_v40, 1  ;;  %v970_v42 = vshll.u32 %v2456_v40, 16  ;;  %v879_v47 = vshrl.u32 %v847_v36, 16  ;;  %v968_v51 = vshrl.u32 %v2456_v40, 16 }
 0x1f2   : > { %v769_v48 = vmul.f32 %v1997_v39, %v2230_v16  ;;  %v882_v57 = vshll.u32 %v847_v36, 16  ;;  %v839_v38 = vsel %vm2464_vm12, %v782_v46, 0.0  ;;  %v977_v63 = vrot.slane %v975_v13, 1 }
 0x1f3   : > { %v1013_v50 = vsel %vm1001_vm11, %v1011_v41, %v1012_v34  ;;  %v972_v52 = vrot.slane %v970_v42, 1  ;;  %v881_v54 = vrot.slane %v879_v47, 7 }
 0x1f4   : > { %1093 = vrot.lane.b32.xlu0 %v2456_v40, %s2044_s23  ;;  %1855 = vmatmul.mubr.msk.bf16.gmra.mxu1 %vm381_vm1, %v1013_v50  ;;  %v783_v58 = vadd.f32 %v769_v48, %v2230_v16 }
 0x1f5   : > { %1065 = vrot.lane.b32.xlu1 %v1010_v15, %s2044_s23  ;;  %1858 = vmatprep.mubr.msk.bf16.mxu1 %vm2043_vm0, %v2042_v1  ;;  %v973_v37 = vor.u32 %v972_v52, %v968_v51  ;;  %v884_v60 = vor.u32 %v882_v57, %v881_v54  ;;  %v927_v55 = vsel %vm2311_vm9, %v881_v54, 0 }
 0x1f6   : > { %v1999_v59 = vpop.eup %1998  ;;  %v840_v61 = vsel %vm2464_vm12, %v783_v58, 0.0  ;;  %v1015_v6 = vrot.slane %v927_v55, 1  ;;  %v987_v27 = vshll.u32 %v927_v55, 16 }
 0x1f7   : > { %v770_v62 = vmul.f32 %v1999_v59, %v2239_v26  ;;  %v848_v16 = vpack.c.bf16 %v840_v61, %v839_v38  ;;  %v2488_v56 = vsel %vm2311_vm9, 0, %v884_v60  ;;  %v2494_v8 = vsel %vm930_vm14, %v973_v37, %v977_v63 }
 0x1f8   : > { %1085 = vrot.lane.b32.xlu0 %v1013_v50, %s2045_s12  ;;  %v1014_v5 = vrot.slane %v2488_v56, 1  ;;  %v982_v11 = vshll.u32 %v2488_v56, 16  ;;  %v980_v45 = vshrl.u32 %v2488_v56, 16  ;;  %v989_v4 = vrot.slane %v987_v27, 1 }
 0x1f9   : > { %1055 = vrot.lane.b32.xlu1 %v2450_v35, %s2045_s12  ;;  %v886_v7 = vshrl.u32 %v848_v16, 16  ;;  %v784_v23 = vadd.f32 %v770_v62, %v2239_v26  ;;  %v889_v14 = vshll.u32 %v848_v16, 16 }
 0x1fa   : > { %v2001_v3 = vpop.eup %2000  ;;  %v1016_v9 = vsel %vm1001_vm11, %v1014_v5, %v1015_v6  ;;  %v984_v24 = vrot.slane %v982_v11, 1 }
 0x1fb   : > { %v771_v44 = vmul.f32 %v2001_v3, %v2241_v28  ;;  %v888_v10 = vrot.slane %v886_v7, 7  ;;  %v841_v19 = vsel %vm814_vm2, %v784_v23, 0.0 }
 0x1fc   : > { %1103 = vrot.lane.b32.xlu0 %v2494_v8, %s2046_s17  ;;  %1859 = vmatmul.mubr.msk.bf16.gmra.mxu1 %vm381_vm1, %v1016_v9  ;;  %v985_v31 = vor.u32 %v984_v24, %v980_v45 }
 0x1fd   : > { %v785_v15 = vadd.f32 %v771_v44, %v2241_v28  ;;  %1075 = vrot.lane.b32.xlu1 %v2456_v40, %s2046_s17  ;;  %1862 = vmatprep.mubr.msk.bf16.mxu1 %vm2043_vm0, %v2042_v1  ;;  %v891_v26 = vor.u32 %v889_v14, %v888_v10  ;;  %v928_v18 = vsel %vm2311_vm9, %v888_v10, 0 }
 0x1fe   : > { %v1032_v0 = vrot.slane %v928_v18, 1  ;;  %v2526_v41 = vsel %vm930_vm14, %v985_v31, %v989_v4  ;;  %v1025_v49 = vshll.u32 %v928_v18, 16 }
 0x1ff   : > { %v842_v20 = vsel %vm814_vm2, %v785_v15, 0.0  ;;  %v921_v21 = vsel %vm2311_vm9, 0, %v891_v26 }
 0x200   : > { %v849_v25 = vpack.c.bf16 %v842_v20, %v841_v19  ;;  %1095 = vrot.lane.b32.xlu0 %v2488_v56, %s2044_s23  ;;  %v1031_v28 = vrot.slane %v921_v21, 1  ;;  %v1020_v42 = vshll.u32 %v921_v21, 16  ;;  %v1018_v17 = vshrl.u32 %v921_v21, 16 }
 0x201   : > { %1067 = vrot.lane.b32.xlu1 %v1013_v50, %s2044_s23  ;;  %v1027_v52 = vrot.slane %v1025_v49, 1 }
 0x202   : > { %v893_v29 = vshrl.u32 %v849_v25, 16  ;;  %v1033_v30 = vsel %vm1001_vm11, %v1031_v28, %v1032_v0  ;;  %v896_v32 = vshll.u32 %v849_v25, 16  ;;  %v1022_v48 = vrot.slane %v1020_v42, 1 }
 0x204   : > { %v895_v33 = vrot.slane %v893_v29, 7  ;;  %1087 = vrot.lane.b32.xlu0 %v1016_v9, %s2045_s12  ;;  %1863 = vmatmul.mubr.msk.bf16.gmra.mxu1 %vm381_vm1, %v1033_v30  ;;  %v1023_v50 = vor.u32 %v1022_v48, %v1018_v17 }
 0x205   : > { %1057 = vrot.lane.b32.xlu1 %v2494_v8, %s2045_s12  ;;  %1866 = vmatprep.mubr.msk.bf16.mxu1 %vm2043_vm0, %v2042_v1  ;;  %vm1121_vm0 = vcmask 523264  }
 0x206   : > { %v898_v36 = vor.u32 %v896_v32, %v895_v33  ;;  %v929_v39 = vsel %vm2311_vm9, %v895_v33, 0  ;;  %v2542_v53 = vsel %vm930_vm14, %v1023_v50, %v1027_v52 }
 0x207   : > { %v1049_v47 = vrot.slane %v929_v39, 1  ;;  %v1042_v57 = vshll.u32 %v929_v39, 16 }
 0x208   : > { %v922_v34 = vsel %vm2311_vm9, 0, %v898_v36  ;;  %1105 = vrot.lane.b32.xlu0 %v2526_v41, %s2046_s17  ;;  %vm1132_vm9 = vcmask 785408  }
 0x209   : > { %v1048_v46 = vrot.slane %v922_v34, 1  ;;  %1077 = vrot.lane.b32.xlu1 %v2488_v56, %s2046_s17  ;;  %v1037_v51 = vshll.u32 %v922_v34, 16  ;;  %v1035_v54 = vshrl.u32 %v922_v34, 16  ;;  %v1044_v59 = vrot.slane %v1042_v57, 1 }
 0x20b   : > { %v1050_v1 = vsel %vm1001_vm11, %v1048_v46, %v1049_v47  ;;  %v1039_v13 = vrot.slane %v1037_v51, 1 }
 0x20c   : > { %1097 = vrot.lane.b32.xlu0 %v921_v21, %s2044_s23  ;;  %1867 = vmatmul.mubr.msk.bf16.gmra.mxu1 %vm381_vm1, %v1050_v1 }
 0x20d   : > { %1069 = vrot.lane.b32.xlu1 %v1016_v9, %s2044_s23  ;;  %v1040_v58 = vor.u32 %v1039_v13, %v1035_v54 }
 0x20f   : > { %v1045_v37 = vsel %vm930_vm14, %v1040_v58, %v1044_v59 }
 0x210   : > { %1089 = vrot.lane.b32.xlu0 %v1033_v30, %s2045_s12 }
 0x211   : > { %1059 = vrot.lane.b32.xlu1 %v2526_v41, %s2045_s12 }
 0x214   : > { %1107 = vrot.lane.b32.xlu0 %v2542_v53, %s2046_s17 }
 0x215   : > { %1079 = vrot.lane.b32.xlu1 %v921_v21, %s2046_s17 }
 0x218   : > { %1099 = vrot.lane.b32.xlu0 %v922_v34, %s2044_s23  ;;  %s1639_s23 = sshll.u32 %s300_s22, 3 }
 0x219   : > { %s2612_s25 = scalar_lea.vmem %s2660_s7, %s1639_s23 }
 0x21c   : > { %1109 = vrot.lane.b32.xlu0 %v1045_v37, %s2046_s17 }
 0x24d   : > { %v1062_v38 = vpop.permute.xlu1 %1061 }
 0x251   : > { %v1052_v55 = vpop.permute.xlu0 %1051 }
 0x252   : > { %v1112_v63 = vsel %vm381_vm1, %v2337_v43, %v1052_v55 }
 0x253   : > { %v1072_v60 = vpop.permute.xlu1 %1071  ;;  %v1123_v6 = vsel %vm1121_vm0, %v1112_v63, %v1062_v38 }
 0x254   : > { %v1134_v14 = vsel %vm1132_vm9, %v1123_v6, %v1072_v60 }
 0x256   : > { %v1082_v62 = vpop.permute.xlu0 %1081 }
 0x257   : > { %v1064_v61 = vpop.permute.xlu1 %1063  ;;  %v1150_v7 = vsel %vm381_vm1, %v2415_v2, %v1082_v62 }
 0x25b   : > { %v1054_v16 = vpop.permute.xlu1 %1053 }
 0x25c   : > { %v1114_v18 = vsel %vm381_vm1, %v2380_v12, %v1054_v16 }
 0x25d   : > { %v1125_v25 = vsel %vm1121_vm0, %v1114_v18, %v1064_v61 }
 0x25e   : > { %v1084_v3 = vpop.permute.xlu0 %1083 }
 0x25f   : > { %v1092_v5 = vpop.permute.xlu1 %1091  ;;  %v1153_v2 = vsel %vm381_vm1, %v2450_v35, %v1084_v3 }
 0x260   : > { %v1164_v44 = vsel %vm1121_vm0, %v1150_v7, %v1092_v5 }
 0x262   : > { %v1102_v23 = vpop.permute.xlu0 %1101 }
 0x263   : > { %v1074_v9 = vpop.permute.xlu1 %1073  ;;  %v1174_v10 = vsel %vm1132_vm9, %v1164_v44, %v1102_v23 }
 0x264   : > { %1386 = vmatprep.mubr.bf16.mxu0 %v1174_v10  ;;  %v1137_v28 = vsel %vm1132_vm9, %v1125_v25, %v1074_v9 }
 0x265   : > { %1387 = vmatmul.mubr.bf16.vlgmr.msra.gmra.mxu0 %v1134_v14 }
 0x266   : > { %v1094_v43 = vpop.permute.xlu0 %1093 }
 0x267   : > { %v1066_v11 = vpop.permute.xlu1 %1065  ;;  %v1166_v19 = vsel %vm1121_vm0, %v1153_v2, %v1094_v43 }
 0x26a   : > { %v1086_v15 = vpop.permute.xlu0 %1085 }
 0x26b   : > { %v1056_v26 = vpop.permute.xlu1 %1055  ;;  %v1156_v35 = vsel %vm381_vm1, %v2494_v8, %v1086_v15 }
 0x26c   : > { %v1116_v12 = vsel %vm381_vm1, %v2419_v22, %v1056_v26 }
 0x26d   : > { %v1127_v4 = vsel %vm1121_vm0, %v1116_v12, %v1066_v11  ;;  %v2606_v11 = vld [vmem:[%s2659_s6] ss:$0 sm:$0xff] }
 0x26e   : > { %v1104_v20 = vpop.permute.xlu0 %1103 }
 0x26f   : > { %v1076_v21 = vpop.permute.xlu1 %1075  ;;  %v1177_v24 = vsel %vm1132_vm9, %v1166_v19, %v1104_v20 }
 0x270   : > { %1394 = vmatprep.mubr.bf16.mxu0 %v1177_v24  ;;  %v1140_v36 = vsel %vm1132_vm9, %v1127_v4, %v1076_v21 }
 0x271   : > { %1395 = vmatmul.mubr.bf16.gmra.mxu0 %v1137_v28 }
 0x272   : > { %v1096_v0 = vpop.permute.xlu0 %1095 }
 0x273   : > { %v1068_v45 = vpop.permute.xlu1 %1067  ;;  %v1168_v30 = vsel %vm1121_vm0, %v1156_v35, %v1096_v0 }
 0x276   : > { %v1088_v27 = vpop.permute.xlu0 %1087 }
 0x277   : > { %v1058_v29 = vpop.permute.xlu1 %1057  ;;  %v1159_v8 = vsel %vm381_vm1, %v2526_v41, %v1088_v27 }
 0x278   : > { %v1118_v22 = vsel %vm381_vm1, %v2456_v40, %v1058_v29 }
 0x279   : > { %v1129_v17 = vsel %vm1121_vm0, %v1118_v22, %v1068_v45 }
 0x27a   : > { %v1106_v31 = vpop.permute.xlu0 %1105 }
 0x27b   : > { %v1078_v33 = vpop.permute.xlu1 %1077  ;;  %v1180_v32 = vsel %vm1132_vm9, %v1168_v30, %v1106_v31 }
 0x27c   : > { %1402 = vmatprep.mubr.bf16.mxu0 %v1180_v32  ;;  %v1143_v49 = vsel %vm1132_vm9, %v1129_v17, %v1078_v33 }
 0x27d   : > { %1403 = vmatmul.mubr.bf16.gmra.mxu0 %v1140_v36 }
 0x27e   : > { %v1098_v39 = vpop.permute.xlu0 %1097 }
 0x27f   : > { %v1070_v34 = vpop.permute.xlu1 %1069  ;;  %v1170_v46 = vsel %vm1121_vm0, %v1159_v8, %v1098_v39 }
 0x282   : > { %v1090_v42 = vpop.permute.xlu0 %1089 }
 0x283   : > { %v1060_v1 = vpop.permute.xlu1 %1059  ;;  %v1162_v40 = vsel %vm381_vm1, %v2542_v53, %v1090_v42 }
 0x284   : > { %v1120_v51 = vsel %vm381_vm1, %v2488_v56, %v1060_v1 }
 0x285   : > { %v1131_v57 = vsel %vm1121_vm0, %v1120_v51, %v1070_v34 }
 0x286   : > { %v1108_v47 = vpop.permute.xlu0 %1107 }
 0x287   : > { %v1183_v48 = vsel %vm1132_vm9, %v1170_v46, %v1108_v47  ;;  %v1080_v41 = vpop.permute.xlu1 %1079 }
 0x288   : > { %1410 = vmatprep.mubr.bf16.mxu0 %v1183_v48  ;;  %v1146_v58 = vsel %vm1132_vm9, %v1131_v57, %v1080_v41 }
 0x289   : > { %1411 = vmatmul.mubr.bf16.gmra.mxu0 %v1143_v49 }
 0x28a   : > { %v1100_v50 = vpop.permute.xlu0 %1099 }
 0x28b   : > { %v1172_v52 = vsel %vm1121_vm0, %v1162_v40, %v1100_v50 }
 0x28e   : > { %v1110_v13 = vpop.permute.xlu0 %1109 }
 0x28f   : > { %v1186_v54 = vsel %vm1132_vm9, %v1172_v52, %v1110_v13 }
 0x290   : > { %1418 = vmatprep.mubr.bf16.mxu0 %v1186_v54 }
 0x291   : > { %1419 = vmatmul.mubr.bf16.gmra.mxu0 %v1146_v58 }
 0x2ac   : > { %v1461_v59 = vpop.f32.mrf.mxu1 }
 0x2ae   : > { %v1852_v37 = vpop.f32.mrf.mxu1 }
 0x2b0   : > { %v1464_v38 = vpop.f32.mrf.mxu1 }
 0x2b2   : > { %v1853_v60 = vpop.f32.mrf.mxu1 }
 0x2b4   : > { %v1469_v56 = vpop.f32.mrf.mxu1 }
 0x2b6   : > { %v1856_v55 = vpop.f32.mrf.mxu1 }
 0x2b8   : > { %v1472_v53 = vpop.f32.mrf.mxu1 }
 0x2ba   : > { %v1857_v61 = vpop.f32.mrf.mxu1 }
 0x2bc   : > { %v1477_v62 = vpop.f32.mrf.mxu1 }
 0x2be   : > { %v1860_v16 = vpop.f32.mrf.mxu1 }
 0x2c0   : > { %v2590_v63 = vpop.f32.mrf.mxu1 }
 0x2c2   : > { %v1861_v3 = vpop.f32.mrf.mxu1 }
 0x2c4   : > { %v2592_v5 = vpop.f32.mrf.mxu1 }
 0x2c6   : > { %v1864_v6 = vpop.f32.mrf.mxu1 }
 0x2c8   : > { %v2594_v7 = vpop.f32.mrf.mxu1 }
 0x2ca   : > { %v1865_v44 = vpop.f32.mrf.mxu1 }
 0x2cc   : > { %v2596_v23 = vpop.f32.mrf.mxu1 }
 0x2ce   : > { %v1868_v9 = vpop.f32.mrf.mxu1 }
 0x2d0   : > { %v2598_v10 = vpop.f32.mrf.mxu1 }
 0x2d2   : > { %v1869_v14 = vpop.f32.mrf.mxu1 }
 0x325   : > { %v1745_v43 = vpop.f32.mrf.mxu0 }
 0x327   : > { %v1746_v15 = vpop.f32.mrf.mxu0 }
 0x328   : > { %v1747_v26 = vadd.f32 %v1746_v15, %v1745_v43 }
 0x329   : > { %v1748_v18 = vpop.f32.mrf.mxu0 }
 0x32a   : > { %v1389_v2 = vadd.f32 %v1747_v26, %v2606_v11 }
 0x32b   : > { %v1749_v19 = vpop.f32.mrf.mxu0 }
 0x32c   : > { %v1462_v20 = vadd.f32 %v1461_v59, %v1389_v2  ;;  %v1750_v21 = vadd.f32 %v1749_v19, %v1748_v18 }
 0x32e   : > { %vm1500_vm1 = vcmp.ge.f32.partialorder %v1462_v20, 0.0  ;;  %v1510_v24 = vmul.f32 0.2, %v1462_v20  ;;  %v1392_v25 = vadd.f32 %v1750_v21, %v2606_v11 }
 0x330   : > { %v1520_v28 = vsel %vm1500_vm1, %v1462_v20, %v1510_v24  ;;  %v1465_v0 = vadd.f32 %v1464_v38, %v1392_v25 }
 0x331   : > { %1530 = vst [vmem:[%s2612_s25] sm:$0xff] %v1520_v28  ;;  %v1751_v45 = vpop.f32.mrf.mxu0 }
 0x332   : > { %vm1501_vm11 = vcmp.ge.f32.partialorder %v1465_v0, 0.0  ;;  %v1511_v27 = vmul.f32 0.2, %v1465_v0 }
 0x333   : > { %v1752_v29 = vpop.f32.mrf.mxu0 }
 0x334   : > { %v1521_v12 = vsel %vm1501_vm11, %v1465_v0, %v1511_v27  ;;  %v1753_v35 = vadd.f32 %v1752_v29, %v1751_v45 }
 0x335   : > { %1531 = vst [vmem:[%s2612_s25 + $0x8] sm:$0xff] %v1521_v12  ;;  %v1754_v30 = vpop.f32.mrf.mxu0 }
 0x336   : > { %v1397_v31 = vadd.f32 %v1753_v35, %v2606_v11 }
 0x337   : > { %v1755_v33 = vpop.f32.mrf.mxu0 }
 0x338   : > { %v1470_v32 = vadd.f32 %v1469_v56, %v1397_v31  ;;  %v1756_v4 = vadd.f32 %v1755_v33, %v1754_v30 }
 0x33a   : > { %vm1502_vm14 = vcmp.ge.f32.partialorder %v1470_v32, 0.0  ;;  %v1512_v36 = vmul.f32 0.2, %v1470_v32  ;;  %v1400_v39 = vadd.f32 %v1756_v4, %v2606_v11 }
 0x33c   : > { %v1522_v34 = vsel %vm1502_vm14, %v1470_v32, %v1512_v36  ;;  %v1473_v42 = vadd.f32 %v1472_v53, %v1400_v39 }
 0x33d   : > { %1532 = vst [vmem:[%s2612_s25 + $0x10] sm:$0xff] %v1522_v34  ;;  %v1757_v22 = vpop.f32.mrf.mxu0 }
 0x33e   : > { %vm1503_vm3 = vcmp.ge.f32.partialorder %v1473_v42, 0.0  ;;  %v1513_v8 = vmul.f32 0.2, %v1473_v42 }
 0x33f   : > { %v1758_v46 = vpop.f32.mrf.mxu0 }
 0x340   : > { %v1523_v47 = vsel %vm1503_vm3, %v1473_v42, %v1513_v8  ;;  %v1759_v1 = vadd.f32 %v1758_v46, %v1757_v22 }
 0x341   : > { %1533 = vst [vmem:[%s2612_s25 + $0x18] sm:$0xff] %v1523_v47  ;;  %v1760_v48 = vpop.f32.mrf.mxu0 }
 0x342   : > { %v1405_v17 = vadd.f32 %v1759_v1, %v2606_v11 }
 0x343   : > { %v1761_v49 = vpop.f32.mrf.mxu0 }
 0x344   : > { %v1478_v50 = vadd.f32 %v1477_v62, %v1405_v17  ;;  %v1762_v51 = vadd.f32 %v1761_v49, %v1760_v48 }
 0x346   : > { %vm1504_vm4 = vcmp.ge.f32.partialorder %v1478_v50, 0.0  ;;  %v1514_v40 = vmul.f32 0.2, %v1478_v50  ;;  %v1408_v41 = vadd.f32 %v1762_v51, %v2606_v11 }
 0x348   : > { %v1524_v52 = vsel %vm1504_vm4, %v1478_v50, %v1514_v40  ;;  %v1481_v13 = vadd.f32 %v2590_v63, %v1408_v41 }
 0x349   : > { %1534 = vst [vmem:[%s2612_s25 + $0x20] sm:$0xff] %v1524_v52  ;;  %v1763_v54 = vpop.f32.mrf.mxu0 }
 0x34a   : > { %vm1505_vm5 = vcmp.ge.f32.partialorder %v1481_v13, 0.0  ;;  %v1515_v57 = vmul.f32 0.2, %v1481_v13 }
 0x34b   : > { %v1764_v58 = vpop.f32.mrf.mxu0 }
 0x34c   : > { %v1525_v59 = vsel %vm1505_vm5, %v1481_v13, %v1515_v57  ;;  %v1765_v37 = vadd.f32 %v1764_v58, %v1763_v54 }
 0x34d   : > { %1535 = vst [vmem:[%s2612_s25 + $0x28] sm:$0xff] %v1525_v59  ;;  %v1766_v38 = vpop.f32.mrf.mxu0 }
 0x34e   : > { %v1413_v60 = vadd.f32 %v1765_v37, %v2606_v11 }
 0x34f   : > { %v1767_v56 = vpop.f32.mrf.mxu0 }
 0x350   : > { %v1486_v55 = vadd.f32 %v2592_v5, %v1413_v60  ;;  %v1768_v53 = vadd.f32 %v1767_v56, %v1766_v38 }
 0x351   : > { %v1769_v61 = vpop.f32.mrf.mxu0 }
 0x352   : > { %vm1506_vm6 = vcmp.ge.f32.partialorder %v1486_v55, 0.0  ;;  %v1516_v62 = vmul.f32 0.2, %v1486_v55  ;;  %v1416_v16 = vadd.f32 %v1768_v53, %v2606_v11 }
 0x353   : > { %v1770_v63 = vpop.f32.mrf.mxu0 }
 0x354   : > { %v1526_v3 = vsel %vm1506_vm6, %v1486_v55, %v1516_v62  ;;  %v1489_v6 = vadd.f32 %v2594_v7, %v1416_v16  ;;  %v1771_v44 = vadd.f32 %v1770_v63, %v1769_v61 }
 0x355   : > { %1536 = vst [vmem:[%s2612_s25 + $0x30] sm:$0xff] %v1526_v3  ;;  %v1772_v9 = vpop.f32.mrf.mxu0 }
 0x356   : > { %vm1507_vm7 = vcmp.ge.f32.partialorder %v1489_v6, 0.0  ;;  %v1517_v14 = vmul.f32 0.2, %v1489_v6  ;;  %v1421_v5 = vadd.f32 %v1771_v44, %v2606_v11 }
 0x357   : > { %v1773_v43 = vpop.f32.mrf.mxu0 }
 0x358   : > { %v1527_v15 = vsel %vm1507_vm7, %v1489_v6, %v1517_v14  ;;  %v1494_v26 = vadd.f32 %v2596_v23, %v1421_v5  ;;  %v1774_v18 = vadd.f32 %v1773_v43, %v1772_v9 }
 0x359   : > { %1537 = vst [vmem:[%s2612_s25 + $0x38] sm:$0xff] %v1527_v15 }
 0x35a   : > { %vm1508_vm8 = vcmp.ge.f32.partialorder %v1494_v26, 0.0  ;;  %v1518_v2 = vmul.f32 0.2, %v1494_v26  ;;  %v1424_v19 = vadd.f32 %v1774_v18, %v2606_v11 }
 0x35c   : > { %v1528_v7 = vsel %vm1508_vm8, %v1494_v26, %v1518_v2  ;;  %v1497_v20 = vadd.f32 %v2598_v10, %v1424_v19 }
 0x35d   : > { %1538 = vst [vmem:[%s2612_s25 + $0x40] sm:$0xff] %v1528_v7 }
 0x35e   : > { %vm1509_vm10 = vcmp.ge.f32.partialorder %v1497_v20, 0.0  ;;  %v1519_v21 = vmul.f32 0.2, %v1497_v20 }
 0x360   : > { %v1529_v24 = vsel %vm1509_vm10, %v1497_v20, %v1519_v21 }
 0x361   : > { %1539 = vst [vmem:[%s2612_s25 + $0x48] sm:$0xff] %v1529_v24 }
 0x362 PF: > { %s17_s28 = sadd.s32 1, %s2040_s28   ;;  %s2673_s24 = smov %s2032_s26 }
 0x363   : > { %p14_p7 = scmp.ge.s32.totalorder %s17_s28, 10   ;;  %s2674_s25 = smov %s2036_s27 }
 0x364   : > { %s2675_s26 = smov %s2678_s29  ;;  %s2676_s27 = smov %s2682_s30 }
 0x365   :  { %16 = sbr.rel (!%p14_p7) target bundleno = 3 (0x3), region = 79 }

</bundles_post_ra>
